<compile_context>
chip_gen: v7x
topology: tpu7x:2x2x1
jax: 0.10.0
libtpu: 0.0.40
codegen_flags: <defaults>
</compile_context>

<pallas_src>
import functools

import jax
import jax.numpy as jnp
from jax.experimental import pallas as pl
from jax.experimental.pallas import tpu as pltpu

EPS = 1e-5
NEG_SLOPE = 0.2
LANE = 128
SUBLANE = 8
MAX_TM = 512                       # rows per M tile (multiple of 8)
MAX_TK = 512                       # K slab per reduction step (multiple of 128)
VMEM_LIMIT = 32 * 1024 * 1024      # explicit scoped-VMEM budget (safe on v5e/v6e/v7x)


def _round_up(x, m):
    return (x + m - 1) // m * m


def _pick_tile(padded_total, unit, max_units):
    """Largest tile (multiple of `unit`, <= max_units*unit) dividing padded_total."""
    n = padded_total // unit
    for cand in range(min(n, max_units), 0, -1):
        if n % cand == 0:
            return cand * unit
    return unit


# ---------------------------------------------------------------------------
# Pass 1: tiled matmul (MXU) + per-M-tile partial BN statistics.
# ---------------------------------------------------------------------------
def _matmul_stats_kernel(p_ref, w_ref, y_ref, psum_ref, psumsq_ref, acc_ref):
    k = pl.program_id(1)

    @pl.when(k == 0)
    def _():
        acc_ref[...] = jnp.zeros_like(acc_ref)

    acc_ref[...] += jnp.dot(p_ref[...], w_ref[...],
                            preferred_element_type=jnp.float32)

    @pl.when(k == pl.num_programs(1) - 1)
    def _():
        y = acc_ref[...]                                   # (TM, Cout_p) f32
        y_ref[...] = y
        colsum = jnp.sum(y, axis=0, keepdims=True)         # (1, Cout_p)
        colsumsq = jnp.sum(y * y, axis=0, keepdims=True)   # (1, Cout_p)
        # Partial-stat blocks are (8, Cout_p) to stay sublane-aligned;
        # the wrapper reads sublane 0 of each tile.
        psum_ref[...] = jnp.broadcast_to(colsum, psum_ref.shape)
        psumsq_ref[...] = jnp.broadcast_to(colsumsq, psumsq_ref.shape)


# ---------------------------------------------------------------------------
# Pass 2: fused BN affine (folded scale/shift) + LeakyReLU.
# ---------------------------------------------------------------------------
def _bn_lrelu_kernel(y_ref, scale_ref, shift_ref, o_ref):
    z = y_ref[...] * scale_ref[...] + shift_ref[...]
    o_ref[...] = jnp.where(z >= 0.0, z, NEG_SLOPE * z)


def _im2col(x, kernel, stride, pad):
    # x: (N, Cin, H, W) -> patches: (N*Ho*Wo, Cin*kernel*kernel), K order = (Cin, kh, kw)
    N, Cin, H, W = x.shape
    Ho = (H + 2 * pad - kernel) // stride + 1
    Wo = (W + 2 * pad - kernel) // stride + 1
    xp = jnp.pad(x, ((0, 0), (0, 0), (pad, pad), (pad, pad)))
    cols = []
    for kh in range(kernel):
        for kw in range(kernel):
            cols.append(xp[:, :, kh:kh + stride * Ho:stride,
                               kw:kw + stride * Wo:stride])   # (N, Cin, Ho, Wo)
    patches = jnp.stack(cols, axis=-1)                        # (N, Cin, Ho, Wo, Kh*Kw)
    patches = jnp.transpose(patches, (0, 2, 3, 1, 4))         # (N, Ho, Wo, Cin, Kh*Kw)
    return patches.reshape(N * Ho * Wo, Cin * kernel * kernel), Ho, Wo


@functools.partial(jax.jit, static_argnames=("stride", "compute_dtype"))
def disc_block(x, conv_w, gamma, beta, *, stride=2, compute_dtype="bfloat16"):
    """x: (N,Cin,H,W) f32; conv_w: (Cout,Cin,4,4); gamma/beta: (Cout,). Returns NCHW f32."""
    compute_dtype = jnp.dtype(compute_dtype)
    N, Cin, H, W = x.shape
    Cout = conv_w.shape[0]

    # TODO(synk): build the im2col patches per M-tile inside the kernel with
    # strided DMAs instead of materializing them; here im2col is at least fused
    # into the same jit so XLA feeds the matmul kernel directly.
    patches, Ho, Wo = _im2col(x.astype(jnp.float32), kernel=4, stride=stride, pad=1)
    M, K = patches.shape

    # Lane-dense padding of channel / K dims, sublane padding of M.
    Cout_p = _round_up(Cout, LANE)
    K_p = _round_up(K, LANE)
    M_p = _round_up(M, SUBLANE)
    TM = _pick_tile(M_p, SUBLANE, MAX_TM // SUBLANE)
    TK = _pick_tile(K_p, LANE, MAX_TK // LANE)
    num_m = M_p // TM
    num_k = K_p // TK

    patches_p = jnp.pad(patches, ((0, M_p - M), (0, K_p - K)))
    w_mat = conv_w.reshape(Cout, K).T.astype(jnp.float32)     # (K, Cout), (Cin,kh,kw)-major
    w_p = jnp.pad(w_mat, ((0, K_p - K), (0, Cout_p - Cout)))
    gamma_p = jnp.pad(gamma.astype(jnp.float32), (0, Cout_p - Cout))  # pad chans: gamma=0
    beta_p = jnp.pad(beta.astype(jnp.float32), (0, Cout_p - Cout))    # pad chans: beta=0

    p_in = patches_p.astype(compute_dtype)
    w_in = w_p.astype(compute_dtype)

    # ---- Pass 1: tiled matmul + per-tile partial BN statistics ----
    y, psum, psumsq = pl.pallas_call(
        _matmul_stats_kernel,
        out_shape=(
            jax.ShapeDtypeStruct((M_p, Cout_p), jnp.float32),
            jax.ShapeDtypeStruct((num_m, SUBLANE, Cout_p), jnp.float32),
            jax.ShapeDtypeStruct((num_m, SUBLANE, Cout_p), jnp.float32),
        ),
        grid_spec=pltpu.PrefetchScalarGridSpec(
            num_scalar_prefetch=0,
            grid=(num_m, num_k),
            in_specs=[
                pl.BlockSpec((TM, TK), lambda m, k: (m, k)),
                pl.BlockSpec((TK, Cout_p), lambda m, k: (k, 0)),
            ],
            out_specs=(
                pl.BlockSpec((TM, Cout_p), lambda m, k: (m, 0)),
                pl.BlockSpec((None, SUBLANE, Cout_p), lambda m, k: (m, 0, 0)),
                pl.BlockSpec((None, SUBLANE, Cout_p), lambda m, k: (m, 0, 0)),
            ),
            scratch_shapes=[pltpu.VMEM((TM, Cout_p), jnp.float32)],
        ),
        compiler_params=pltpu.CompilerParams(
            dimension_semantics=("parallel", "arbitrary"),
            vmem_limit_bytes=VMEM_LIMIT,
        ),
    )(p_in, w_in)

    # ---- Glue: fold partial stats into per-channel scale / shift (f32) ----
    m_true = jnp.float32(M)              # padded rows are all-zero -> contribute 0 to sums
    total_sum = jnp.sum(psum[:, 0, :], axis=0)        # (Cout_p,)
    total_sumsq = jnp.sum(psumsq[:, 0, :], axis=0)    # (Cout_p,)
    mean = total_sum / m_true
    var = jnp.maximum(total_sumsq / m_true - mean * mean, 0.0)   # biased var, guarded
    scale = gamma_p * jax.lax.rsqrt(var + EPS)
    shift = beta_p - mean * scale
    scale2 = scale.reshape(1, Cout_p)
    shift2 = shift.reshape(1, Cout_p)

    # ---- Pass 2: fused BN affine + LeakyReLU (lane-dense output) ----
    out_p = pl.pallas_call(
        _bn_lrelu_kernel,
        out_shape=jax.ShapeDtypeStruct((M_p, Cout_p), jnp.float32),
        grid_spec=pltpu.PrefetchScalarGridSpec(
            num_scalar_prefetch=0,
            grid=(num_m,),
            in_specs=[
                pl.BlockSpec((TM, Cout_p), lambda m: (m, 0)),
                pl.BlockSpec((1, Cout_p), lambda m: (0, 0)),
                pl.BlockSpec((1, Cout_p), lambda m: (0, 0)),
            ],
            out_specs=pl.BlockSpec((TM, Cout_p), lambda m: (m, 0)),
        ),
        compiler_params=pltpu.CompilerParams(
            dimension_semantics=("parallel",),
            vmem_limit_bytes=VMEM_LIMIT,
        ),
    )(y, scale2, shift2)

    out = out_p[:M, :Cout].reshape(N, Ho, Wo, Cout).transpose(0, 3, 1, 2)
    return out


def disc_block_reference(x, conv_w, gamma, beta, stride=2):
    # Pure-JAX reference for validation.
    y = jax.lax.conv_general_dilated(
        x.astype(jnp.float32), conv_w.astype(jnp.float32),
        window_strides=(stride, stride), padding=((1, 1), (1, 1)),
        dimension_numbers=("NCHW", "OIHW", "NCHW"),
    )
    mean = jnp.mean(y, axis=(0, 2, 3), keepdims=True)
    var = jnp.mean((y - mean) ** 2, axis=(0, 2, 3), keepdims=True)
    y_hat = (y - mean) * jax.lax.rsqrt(var + EPS)
    z = y_hat * gamma.reshape(1, -1, 1, 1) + beta.reshape(1, -1, 1, 1)
    return jnp.where(z >= 0.0, z, NEG_SLOPE * z)


if __name__ == "__main__":
    key = jax.random.PRNGKey(0)
    k_x, k_w = jax.random.split(key)

    N, Cin, H, W = 2, 4, 16, 16
    Cout = 8
    stride = 2

    x = jax.random.normal(k_x, (N, Cin, H, W), dtype=jnp.float32)
    # PyTorch shapes: Conv2d weight (Cout, Cin, 4, 4); BN affine gamma=1, beta=0.
    conv_w = jax.random.normal(k_w, (Cout, Cin, 4, 4), dtype=jnp.float32) * 0.1
    gamma = jnp.ones((Cout,), dtype=jnp.float32)
    beta = jnp.zeros((Cout,), dtype=jnp.float32)

    ref = jax.block_until_ready(
        disc_block_reference(x, conv_w, gamma, beta, stride=stride))

    # f32 MXU path: tight check against the f32 reference.
    out_f32 = jax.block_until_ready(
        disc_block(x, conv_w, gamma, beta, stride=stride, compute_dtype="float32"))
    assert out_f32.shape == (N, Cout, H // 2, W // 2), out_f32.shape
    assert jnp.allclose(out_f32, ref, atol=1e-4, rtol=1e-4), (
        float(jnp.max(jnp.abs(out_f32 - ref))))

    # bf16 MXU inputs with f32 accumulation (fast path on v5e/v6e/v7x): loose check.
    out_bf16 = jax.block_until_ready(
        disc_block(x, conv_w, gamma, beta, stride=stride, compute_dtype="bfloat16"))
    assert out_bf16.shape == (N, Cout, H // 2, W // 2), out_bf16.shape
    assert jnp.allclose(out_bf16, ref, atol=5e-2, rtol=5e-2), (
        float(jnp.max(jnp.abs(out_bf16 - ref))))

    print("KERNEL_OK")
</pallas_src>

<mosaic_0001>
module attributes {stable_mosaic.version = 11 : i64} {
  func.func @_matmul_stats_kernel(%arg0: i32, %arg1: i32, %arg2: memref<128x128xf32, #tpu.memory_space<vmem>>, %arg3: memref<128x128xf32, #tpu.memory_space<vmem>>, %arg4: memref<128x128xf32, #tpu.memory_space<vmem>>, %arg5: memref<1x8x128xf32, #tpu.memory_space<vmem>>, %arg6: memref<1x8x128xf32, #tpu.memory_space<vmem>>, %arg7: memref<128x128xf32, #tpu.memory_space<vmem>>) attributes {dimension_semantics = [#tpu.dimension_semantics<parallel>, #tpu.dimension_semantics<arbitrary>], iteration_bounds = array<i64: 1, 1>, scalar_prefetch = 0 : i64, scratch_operands = 1 : i64, tpu.core_type = #tpu.core_type<tc>, window_params = [{transform_indices = @transform_0, window_bounds = array<i64: 128, 128>}, {transform_indices = @transform_1, window_bounds = array<i64: 128, 128>}, {transform_indices = @transform_2, window_bounds = array<i64: 128, 128>}, {transform_indices = @transform_3, window_bounds = array<i64: 1, 8, 128>}, {transform_indices = @transform_4, window_bounds = array<i64: 1, 8, 128>}]} {
    %c0_i32 = arith.constant 0 : i32
    %0 = arith.cmpi eq, %arg1, %c0_i32 : i32
    %1 = arith.extui %0 : i1 to i32
    %c0_i32_0 = arith.constant 0 : i32
    %2 = arith.cmpi ne, %1, %c0_i32_0 : i32
    scf.if %2 {
      %cst_10 = arith.constant 0.000000e+00 : f32
      %12 = vector.broadcast %cst_10 : f32 to vector<128x128xf32>
      %c0_11 = arith.constant 0 : index
      %c0_12 = arith.constant 0 : index
      %13 = vector.load %arg7[%c0_11, %c0_12] : memref<128x128xf32, #tpu.memory_space<vmem>>, vector<128x128xf32>
      tpu.vector_store %arg7[%c0_11, %c0_12], %12 {strides = array<i32>} : memref<128x128xf32, #tpu.memory_space<vmem>>, vector<128x128xf32>,
    } else {
    }
    %c0 = arith.constant 0 : index
    %c0_1 = arith.constant 0 : index
    %3 = vector.load %arg7[%c0, %c0_1] : memref<128x128xf32, #tpu.memory_space<vmem>>, vector<128x128xf32>
    %c0_2 = arith.constant 0 : index
    %c0_3 = arith.constant 0 : index
    %4 = vector.load %arg2[%c0_2, %c0_3] : memref<128x128xf32, #tpu.memory_space<vmem>>, vector<128x128xf32>
    %c0_4 = arith.constant 0 : index
    %c0_5 = arith.constant 0 : index
    %5 = vector.load %arg3[%c0_4, %c0_5] : memref<128x128xf32, #tpu.memory_space<vmem>>, vector<128x128xf32>
    %cst = arith.constant dense<0.000000e+00> : vector<128x128xf32>
    %6 = tpu.matmul %4, %5, %cst {dimension_numbers = #tpu.dot_dimension_numbers<[1], [0], [0], [1], [0, 0, 1, 1], [], []>} : vector<128x128xf32>, vector<128x128xf32>, vector<128x128xf32> -> vector<128x128xf32>
    %7 = arith.addf %3, %6 : vector<128x128xf32>
    %c0_6 = arith.constant 0 : index
    %c0_7 = arith.constant 0 : index
    %8 = vector.load %arg7[%c0_6, %c0_7] : memref<128x128xf32, #tpu.memory_space<vmem>>, vector<128x128xf32>
    tpu.vector_store %arg7[%c0_6, %c0_7], %7 {strides = array<i32>} : memref<128x128xf32, #tpu.memory_space<vmem>>, vector<128x128xf32>,
    %c0_i32_8 = arith.constant 0 : i32
    %9 = arith.cmpi eq, %arg1, %c0_i32_8 : i32
    %10 = arith.extui %9 : i1 to i32
    %c0_i32_9 = arith.constant 0 : i32
    %11 = arith.cmpi ne, %10, %c0_i32_9 : i32
    scf.if %11 {
      %c0_10 = arith.constant 0 : index
      %c0_11 = arith.constant 0 : index
      %12 = vector.load %arg7[%c0_10, %c0_11] : memref<128x128xf32, #tpu.memory_space<vmem>>, vector<128x128xf32>
      %c0_12 = arith.constant 0 : index
      %c0_13 = arith.constant 0 : index
      %13 = vector.load %arg4[%c0_12, %c0_13] : memref<128x128xf32, #tpu.memory_space<vmem>>, vector<128x128xf32>
      tpu.vector_store %arg4[%c0_12, %c0_13], %12 {strides = array<i32>} : memref<128x128xf32, #tpu.memory_space<vmem>>, vector<128x128xf32>,
      %cst_14 = arith.constant dense<0.000000e+00> : vector<128xf32>
      %14 = vector.multi_reduction <add>, %12, %cst_14 [0] : vector<128x128xf32> to vector<128xf32>
      %15 = vector.shape_cast %14 : vector<128xf32> to vector<1x128xf32>
      %16 = arith.mulf %12, %12 : vector<128x128xf32>
      %cst_15 = arith.constant dense<0.000000e+00> : vector<128xf32>
      %17 = vector.multi_reduction <add>, %16, %cst_15 [0] : vector<128x128xf32> to vector<128xf32>
      %18 = vector.shape_cast %17 : vector<128xf32> to vector<1x128xf32>
      %19 = vector.shape_cast %15 : vector<1x128xf32> to vector<1x128xf32>
      %20 = vector.broadcast %19 : vector<1x128xf32> to vector<8x128xf32>
      %c0_16 = arith.constant 0 : index
      %c0_17 = arith.constant 0 : index
      %c0_18 = arith.constant 0 : index
      %21 = vector.load %arg5[%c0_16, %c0_17, %c0_18] : memref<1x8x128xf32, #tpu.memory_space<vmem>>, vector<1x8x128xf32>
      %22 = vector.shape_cast %21 : vector<1x8x128xf32> to vector<8x128xf32>
      %23 = vector.shape_cast %20 : vector<8x128xf32> to vector<1x8x128xf32>
      tpu.vector_store %arg5[%c0_16, %c0_17, %c0_18], %23 {strides = array<i32>} : memref<1x8x128xf32, #tpu.memory_space<vmem>>, vector<1x8x128xf32>,
      %24 = vector.shape_cast %18 : vector<1x128xf32> to vector<1x128xf32>
      %25 = vector.broadcast %24 : vector<1x128xf32> to vector<8x128xf32>
      %c0_19 = arith.constant 0 : index
      %c0_20 = arith.constant 0 : index
      %c0_21 = arith.constant 0 : index
      %26 = vector.load %arg6[%c0_19, %c0_20, %c0_21] : memref<1x8x128xf32, #tpu.memory_space<vmem>>, vector<1x8x128xf32>
      %27 = vector.shape_cast %26 : vector<1x8x128xf32> to vector<8x128xf32>
      %28 = vector.shape_cast %25 : vector<8x128xf32> to vector<1x8x128xf32>
      tpu.vector_store %arg6[%c0_19, %c0_20, %c0_21], %28 {strides = array<i32>} : memref<1x8x128xf32, #tpu.memory_space<vmem>>, vector<1x8x128xf32>,
    } else {
    }
    return
  }
  func.func @transform_0(%arg0: i32, %arg1: i32) -> (i32, i32) {
    %c0_i32 = arith.constant 0 : i32
    return %arg0, %arg1 : i32, i32
  }
  func.func @transform_1(%arg0: i32, %arg1: i32) -> (i32, i32) {
    %c0_i32 = arith.constant 0 : i32
    %c0_i32_0 = arith.constant 0 : i32
    return %arg1, %c0_i32 : i32, i32
  }
  func.func @transform_2(%arg0: i32, %arg1: i32) -> (i32, i32) {
    %c0_i32 = arith.constant 0 : i32
    %c0_i32_0 = arith.constant 0 : i32
    return %arg0, %c0_i32 : i32, i32
  }
  func.func @transform_3(%arg0: i32, %arg1: i32) -> (i32, i32, i32) {
    %c0_i32 = arith.constant 0 : i32
    %c0_i32_0 = arith.constant 0 : i32
    %c0_i32_1 = arith.constant 0 : i32
    return %arg0, %c0_i32, %c0_i32_0 : i32, i32, i32
  }
  func.func @transform_4(%arg0: i32, %arg1: i32) -> (i32, i32, i32) {
    %c0_i32 = arith.constant 0 : i32
    %c0_i32_0 = arith.constant 0 : i32
    %c0_i32_1 = arith.constant 0 : i32
    return %arg0, %c0_i32, %c0_i32_0 : i32, i32, i32
  }
}

module attributes {stable_mosaic.version = 11 : i64} {
  func.func @_bn_lrelu_kernel(%arg0: i32, %arg1: memref<128x128xf32, #tpu.memory_space<vmem>>, %arg2: memref<1x128xf32, #tpu.memory_space<vmem>>, %arg3: memref<1x128xf32, #tpu.memory_space<vmem>>, %arg4: memref<128x128xf32, #tpu.memory_space<vmem>>) attributes {dimension_semantics = [#tpu.dimension_semantics<parallel>], iteration_bounds = array<i64: 1>, scalar_prefetch = 0 : i64, scratch_operands = 0 : i64, tpu.core_type = #tpu.core_type<tc>, window_params = [{transform_indices = @transform_0, window_bounds = array<i64: 128, 128>}, {pipeline_mode = #tpu.pipeline_mode<synchronous>, transform_indices = @transform_1, window_bounds = array<i64: 1, 128>}, {pipeline_mode = #tpu.pipeline_mode<synchronous>, transform_indices = @transform_2, window_bounds = array<i64: 1, 128>}, {transform_indices = @transform_3, window_bounds = array<i64: 128, 128>}]} {
    %c0 = arith.constant 0 : index
    %c0_0 = arith.constant 0 : index
    %0 = vector.load %arg1[%c0, %c0_0] : memref<128x128xf32, #tpu.memory_space<vmem>>, vector<128x128xf32>
    %c0_1 = arith.constant 0 : index
    %c0_2 = arith.constant 0 : index
    %1 = vector.load %arg2[%c0_1, %c0_2] : memref<1x128xf32, #tpu.memory_space<vmem>>, vector<1x128xf32>
    %2 = vector.broadcast %1 : vector<1x128xf32> to vector<128x128xf32>
    %3 = arith.mulf %0, %2 : vector<128x128xf32>
    %c0_3 = arith.constant 0 : index
    %c0_4 = arith.constant 0 : index
    %4 = vector.load %arg3[%c0_3, %c0_4] : memref<1x128xf32, #tpu.memory_space<vmem>>, vector<1x128xf32>
    %5 = vector.broadcast %4 : vector<1x128xf32> to vector<128x128xf32>
    %6 = arith.addf %3, %5 : vector<128x128xf32>
    %cst = arith.constant 0.000000e+00 : f32
    %7 = vector.broadcast %cst : f32 to vector<128x128xf32>
    %8 = arith.cmpf oge, %6, %7 : vector<128x128xf32>
    %cst_5 = arith.constant 2.000000e-01 : f32
    %9 = vector.broadcast %cst_5 : f32 to vector<128x128xf32>
    %10 = arith.mulf %9, %6 : vector<128x128xf32>
    %11 = arith.select %8, %6, %10 : vector<128x128xi1>, vector<128x128xf32>
    %c0_6 = arith.constant 0 : index
    %c0_7 = arith.constant 0 : index
    %12 = vector.load %arg4[%c0_6, %c0_7] : memref<128x128xf32, #tpu.memory_space<vmem>>, vector<128x128xf32>
    tpu.vector_store %arg4[%c0_6, %c0_7], %11 {strides = array<i32>} : memref<128x128xf32, #tpu.memory_space<vmem>>, vector<128x128xf32>,
    return
  }
  func.func @transform_0(%arg0: i32) -> (i32, i32) {
    %c0_i32 = arith.constant 0 : i32
    %c0_i32_0 = arith.constant 0 : i32
    return %arg0, %c0_i32 : i32, i32
  }
  func.func @transform_1(%arg0: i32) -> (i32, i32) {
    %c0_i32 = arith.constant 0 : i32
    %c0_i32_0 = arith.constant 0 : i32
    %c0_i32_1 = arith.constant 0 : i32
    return %c0_i32, %c0_i32_0 : i32, i32
  }
  func.func @transform_2(%arg0: i32) -> (i32, i32) {
    %c0_i32 = arith.constant 0 : i32
    %c0_i32_0 = arith.constant 0 : i32
    %c0_i32_1 = arith.constant 0 : i32
    return %c0_i32, %c0_i32_0 : i32, i32
  }
  func.func @transform_3(%arg0: i32) -> (i32, i32) {
    %c0_i32 = arith.constant 0 : i32
    %c0_i32_0 = arith.constant 0 : i32
    return %arg0, %c0_i32 : i32, i32
  }
}

</mosaic_0001>

<bundles_post_ra>
// kernel: disc_block.3
= control target key start
LH: loop header
LB: loop body
LE: loop exit
PB: predicated region body
PF: predicated region fallthrough
CT: control target
= control target key end

     0   :  { %s305_s0 = inlined_call_operand.vmem [shape: f32[128,128], index: 0, kind: input, shape index: {}]   ;;  %s306_s1 = inlined_call_operand.vmem [shape: f32[1,128], index: 1, kind: input, shape index: {}]   ;;  %s307_s2 = inlined_call_operand.vmem [shape: f32[1,128], index: 2, kind: input, shape index: {}]   ;;  %s308_s3 = inlined_call_operand.vmem [shape: f32[128,128], index: 3, kind: output, shape index: {}]  }
   0x1   :  { %v14_v0 = vld [vmem:[%s305_s0] sm:$0xff]  ;;  %v15_v4 = vld [vmem:[%s305_s0 + $0x8] sm:$0xff]  ;;  %v16_v5 = vld [vmem:[%s305_s0 + $0x10] sm:$0xff] }
   0x2   :  { %v172_v1 = vld [vmem:[%s306_s1] ss:$0 sm:$0xff]  ;;  %v17_v6 = vld [vmem:[%s305_s0 + $0x18] sm:$0xff]  ;;  %v19_v11 = vld [vmem:[%s305_s0 + $0x28] sm:$0xff] }
   0x3   :  { %v177_v2 = vld [vmem:[%s307_s2] ss:$0 sm:$0xff]  ;;  %v37_v3 = vmul.f32 %v172_v1, %v14_v0  ;;  %v38_v7 = vmul.f32 %v172_v1, %v15_v4  ;;  %v39_v8 = vmul.f32 %v172_v1, %v16_v5  ;;  %v40_v9 = vmul.f32 %v172_v1, %v17_v6  ;;  %v20_v12 = vld [vmem:[%s305_s0 + $0x30] sm:$0xff]  ;;  %v21_v17 = vld [vmem:[%s305_s0 + $0x38] sm:$0xff] }
   0x4   :  { %v18_v10 = vld [vmem:[%s305_s0 + $0x20] sm:$0xff]  ;;  %v42_v15 = vmul.f32 %v172_v1, %v19_v11  ;;  %v43_v16 = vmul.f32 %v172_v1, %v20_v12  ;;  %v44_v21 = vmul.f32 %v172_v1, %v21_v17  ;;  %v23_v30 = vld [vmem:[%s305_s0 + $0x48] sm:$0xff]  ;;  %v24_v31 = vld [vmem:[%s305_s0 + $0x50] sm:$0xff] }
   0x5   :  { %v60_v13 = vadd.f32 %v177_v2, %v37_v3  ;;  %v41_v14 = vmul.f32 %v172_v1, %v18_v10  ;;  %v61_v18 = vadd.f32 %v177_v2, %v38_v7  ;;  %v62_v19 = vadd.f32 %v177_v2, %v39_v8  ;;  %v22_v25 = vld [vmem:[%s305_s0 + $0x40] sm:$0xff]  ;;  %v25_v43 = vld [vmem:[%s305_s0 + $0x58] sm:$0xff]  ;;  %v27_v45 = vld [vmem:[%s305_s0 + $0x68] sm:$0xff] }
   0x6   :  { %v63_v20 = vadd.f32 %v177_v2, %v40_v9  ;;  %v65_v24 = vadd.f32 %v177_v2, %v42_v15  ;;  %v66_v37 = vadd.f32 %v177_v2, %v43_v16  ;;  %v67_v38 = vadd.f32 %v177_v2, %v44_v21  ;;  %v26_v44 = vld [vmem:[%s305_s0 + $0x60] sm:$0xff]  ;;  %v28_v56 = vld [vmem:[%s305_s0 + $0x70] sm:$0xff]  ;;  %v29_v4 = vld [vmem:[%s305_s0 + $0x78] sm:$0xff] }
   0x7   :  { %vm76_vm0 = vcmp.ge.f32.partialorder %v60_v13, 0.0  ;;  %v92_v22 = vmul.f32 0.2, %v60_v13  ;;  %v64_v23 = vadd.f32 %v177_v2, %v41_v14  ;;  %vm77_vm1 = vcmp.ge.f32.partialorder %v61_v18, 0.0 }
   0x8   :  { %v93_v26 = vmul.f32 0.2, %v61_v18  ;;  %vm78_vm2 = vcmp.ge.f32.partialorder %v62_v19, 0.0  ;;  %v94_v27 = vmul.f32 0.2, %v62_v19  ;;  %vm79_vm3 = vcmp.ge.f32.partialorder %v63_v20, 0.0 }
   0x9   :  { %v108_v28 = vsel %vm76_vm0, %v60_v13, %v92_v22  ;;  %v95_v29 = vmul.f32 0.2, %v63_v20  ;;  %vm80_vm4 = vcmp.ge.f32.partialorder %v64_v23, 0.0  ;;  %v96_v34 = vmul.f32 0.2, %v64_v23 }
   0xa   :  { %124 = vst [vmem:[%s308_s3] sm:$0xff] %v108_v28  ;;  %v109_v32 = vsel %vm77_vm1, %v61_v18, %v93_v26  ;;  %v110_v33 = vsel %vm78_vm2, %v62_v19, %v94_v27  ;;  %vm81_vm5 = vcmp.ge.f32.partialorder %v65_v24, 0.0  ;;  %v97_v36 = vmul.f32 0.2, %v65_v24 }
   0xb   :  { %125 = vst [vmem:[%s308_s3 + $0x8] sm:$0xff] %v109_v32  ;;  %126 = vst [vmem:[%s308_s3 + $0x10] sm:$0xff] %v110_v33  ;;  %v111_v35 = vsel %vm79_vm3, %v63_v20, %v95_v29  ;;  %v112_v39 = vsel %vm80_vm4, %v64_v23, %v96_v34  ;;  %v45_v40 = vmul.f32 %v172_v1, %v22_v25  ;;  %vm82_vm6 = vcmp.ge.f32.partialorder %v66_v37, 0.0 }
   0xc   :  { %127 = vst [vmem:[%s308_s3 + $0x18] sm:$0xff] %v111_v35  ;;  %v46_v41 = vmul.f32 %v172_v1, %v23_v30  ;;  %v47_v42 = vmul.f32 %v172_v1, %v24_v31  ;;  %128 = vst [vmem:[%s308_s3 + $0x20] sm:$0xff] %v112_v39  ;;  %v113_v46 = vsel %vm81_vm5, %v65_v24, %v97_v36  ;;  %v98_v47 = vmul.f32 0.2, %v66_v37 }
   0xd   :  { %vm83_vm7 = vcmp.ge.f32.partialorder %v67_v38, 0.0  ;;  %129 = vst [vmem:[%s308_s3 + $0x28] sm:$0xff] %v113_v46  ;;  %v99_v48 = vmul.f32 0.2, %v67_v38  ;;  %v68_v49 = vadd.f32 %v177_v2, %v45_v40  ;;  %v48_v53 = vmul.f32 %v172_v1, %v25_v43 }
   0xe   :  { %v69_v50 = vadd.f32 %v177_v2, %v46_v41  ;;  %v70_v51 = vadd.f32 %v177_v2, %v47_v42  ;;  %v114_v52 = vsel %vm82_vm6, %v66_v37, %v98_v47  ;;  %v49_v54 = vmul.f32 %v172_v1, %v26_v44 }
   0xf   :  { %v50_v55 = vmul.f32 %v172_v1, %v27_v45  ;;  %130 = vst [vmem:[%s308_s3 + $0x30] sm:$0xff] %v114_v52  ;;  %v115_v57 = vsel %vm83_vm7, %v67_v38, %v99_v48  ;;  %vm84_vm8 = vcmp.ge.f32.partialorder %v68_v49, 0.0  ;;  %v100_v58 = vmul.f32 0.2, %v68_v49 }
  0x10   :  { %vm85_vm9 = vcmp.ge.f32.partialorder %v69_v50, 0.0  ;;  %131 = vst [vmem:[%s308_s3 + $0x38] sm:$0xff] %v115_v57  ;;  %v101_v59 = vmul.f32 0.2, %v69_v50  ;;  %vm86_vm10 = vcmp.ge.f32.partialorder %v70_v51, 0.0  ;;  %v71_v61 = vadd.f32 %v177_v2, %v48_v53 }
  0x11   :  { %v102_v60 = vmul.f32 0.2, %v70_v51  ;;  %v116_v62 = vsel %vm84_vm8, %v68_v49, %v100_v58  ;;  %v72_v63 = vadd.f32 %v177_v2, %v49_v54  ;;  %v73_v0 = vadd.f32 %v177_v2, %v50_v55 }
  0x12   :  { %v51_v3 = vmul.f32 %v172_v1, %v28_v56  ;;  %132 = vst [vmem:[%s308_s3 + $0x40] sm:$0xff] %v116_v62  ;;  %v117_v5 = vsel %vm85_vm9, %v69_v50, %v101_v59  ;;  %vm87_vm11 = vcmp.ge.f32.partialorder %v71_v61, 0.0  ;;  %v103_v7 = vmul.f32 0.2, %v71_v61 }
  0x13   :  { %v118_v6 = vsel %vm86_vm10, %v70_v51, %v102_v60  ;;  %133 = vst [vmem:[%s308_s3 + $0x48] sm:$0xff] %v117_v5  ;;  %vm88_vm12 = vcmp.ge.f32.partialorder %v72_v63, 0.0  ;;  %v104_v8 = vmul.f32 0.2, %v72_v63  ;;  %vm89_vm13 = vcmp.ge.f32.partialorder %v73_v0, 0.0 }
  0x14   :  { %134 = vst [vmem:[%s308_s3 + $0x50] sm:$0xff] %v118_v6  ;;  %v105_v9 = vmul.f32 0.2, %v73_v0  ;;  %v119_v10 = vsel %vm87_vm11, %v71_v61, %v103_v7  ;;  %v74_v11 = vadd.f32 %v177_v2, %v51_v3  ;;  %v52_v12 = vmul.f32 %v172_v1, %v29_v4 }
  0x15   :  { %135 = vst [vmem:[%s308_s3 + $0x58] sm:$0xff] %v119_v10  ;;  %v120_v13 = vsel %vm88_vm12, %v72_v63, %v104_v8 }
  0x16   :  { %v121_v14 = vsel %vm89_vm13, %v73_v0, %v105_v9  ;;  %136 = vst [vmem:[%s308_s3 + $0x60] sm:$0xff] %v120_v13  ;;  %vm90_vm14 = vcmp.ge.f32.partialorder %v74_v11, 0.0  ;;  %v106_v15 = vmul.f32 0.2, %v74_v11  ;;  %v75_v16 = vadd.f32 %v177_v2, %v52_v12 }
  0x17   :  { %137 = vst [vmem:[%s308_s3 + $0x68] sm:$0xff] %v121_v14 }
  0x18   :  { %v122_v17 = vsel %vm90_vm14, %v74_v11, %v106_v15  ;;  %vm91_vm15 = vcmp.ge.f32.partialorder %v75_v16, 0.0  ;;  %v107_v1 = vmul.f32 0.2, %v75_v16 }
  0x19   :  { %138 = vst [vmem:[%s308_s3 + $0x70] sm:$0xff] %v122_v17 }
  0x1a   :  { %v123_v18 = vsel %vm91_vm15, %v75_v16, %v107_v1 }
  0x1b   :  { %139 = vst [vmem:[%s308_s3 + $0x78] sm:$0xff] %v123_v18 }

// kernel: disc_block.2
= control target key start
LH: loop header
LB: loop body
LE: loop exit
PB: predicated region body
PF: predicated region fallthrough
CT: control target
= control target key end

     0   :  { %s677_s1 = inlined_call_operand.vmem [shape: f32[128,128], index: 1, kind: input, shape index: {}]   ;;  %s678_s0 = inlined_call_operand.vmem [shape: f32[128,128], index: 0, kind: input, shape index: {}]   ;;  %s679_s2 = inlined_call_operand.vmem [shape: f32[128,128], index: 2, kind: output, shape index: {0}]   ;;  %s680_s3 = inlined_call_operand.vmem [shape: f32[1,8,128], index: 3, kind: output, shape index: {1}]   ;;  %s681_s4 = inlined_call_operand.vmem [shape: f32[1,8,128], index: 4, kind: output, shape index: {2}]  }
   0x1   :  { %v66_v0 = vld [vmem:[%s677_s1] sm:$0xff]  ;;  %v67_v1 = vld [vmem:[%s677_s1 + $0x8] sm:$0xff]  ;;  %v68_v2 = vld [vmem:[%s677_s1 + $0x10] sm:$0xff] }
   0x2   :  { %v454_v3 = vpack.c.bf16 %v67_v1, %v66_v0  ;;  %v69_v4 = vld [vmem:[%s677_s1 + $0x18] sm:$0xff]  ;;  %v70_v6 = vld [vmem:[%s677_s1 + $0x20] sm:$0xff]  ;;  %v71_v7 = vld [vmem:[%s677_s1 + $0x28] sm:$0xff] }
   0x3   :  { %v458_v5 = vpack.c.bf16 %v69_v4, %v68_v2  ;;  %v462_v8 = vpack.c.bf16 %v71_v7, %v70_v6  ;;  %v50_v9 = vld [vmem:[%s678_s0] sm:$0xff]  ;;  %v72_v10 = vld [vmem:[%s677_s1 + $0x30] sm:$0xff]  ;;  %v73_v11 = vld [vmem:[%s677_s1 + $0x38] sm:$0xff] }
   0x4   :  { %455 = vmatprep.subr.bf16.mxu0 %v454_v3  ;;  %486 = vmatprep.subr.bf16.mxu1 %v454_v3  ;;  %v58_v12 = vld [vmem:[%s678_s0 + $0x40] sm:$0xff]  ;;  %v466_v13 = vpack.c.bf16 %v73_v11, %v72_v10  ;;  %v75_v15 = vld [vmem:[%s677_s1 + $0x48] sm:$0xff]  ;;  %v76_v17 = vld [vmem:[%s677_s1 + $0x50] sm:$0xff] }
   0x5   :  { %457 = vmatpush3.bf16.msra.mxu0 %v454_v3  ;;  %494 = vmatpush3.bf16.msra.mxu1 %v454_v3  ;;  %v74_v14 = vld [vmem:[%s677_s1 + $0x40] sm:$0xff]  ;;  %v77_v18 = vld [vmem:[%s677_s1 + $0x58] sm:$0xff]  ;;  %v79_v21 = vld [vmem:[%s677_s1 + $0x68] sm:$0xff] }
   0x6   :  { %459 = vmatprep.subr.bf16.mxu0 %v458_v5  ;;  %487 = vmatprep.subr.bf16.mxu1 %v458_v5  ;;  %v470_v16 = vpack.c.bf16 %v75_v15, %v74_v14  ;;  %v474_v19 = vpack.c.bf16 %v77_v18, %v76_v17  ;;  %v78_v20 = vld [vmem:[%s677_s1 + $0x60] sm:$0xff]  ;;  %v80_v23 = vld [vmem:[%s677_s1 + $0x70] sm:$0xff]  ;;  %v81_v24 = vld [vmem:[%s677_s1 + $0x78] sm:$0xff] }
   0x7   :  { %430 = vmatprep.mubr.f32.mxu0 %v50_v9  ;;  %442 = vmatprep.mubr.f32.mxu1 %v58_v12  ;;  %v478_v22 = vpack.c.bf16 %v79_v21, %v78_v20  ;;  %v482_v25 = vpack.c.bf16 %v81_v24, %v80_v23  ;;  %v51_v26 = vld [vmem:[%s678_s0 + $0x8] sm:$0xff]  ;;  %v52_v28 = vld [vmem:[%s678_s0 + $0x10] sm:$0xff]  ;;  %v53_v30 = vld [vmem:[%s678_s0 + $0x18] sm:$0xff] }
   0x8   :  { %v59_v27 = vld [vmem:[%s678_s0 + $0x48] sm:$0xff]  ;;  %v60_v29 = vld [vmem:[%s678_s0 + $0x50] sm:$0xff]  ;;  %v61_v31 = vld [vmem:[%s678_s0 + $0x58] sm:$0xff] }
   0x9   :  { %461 = vmatpush3.bf16.msra.mxu0 %v458_v5  ;;  %495 = vmatpush3.bf16.msra.mxu1 %v458_v5  ;;  %v54_v32 = vld [vmem:[%s678_s0 + $0x20] sm:$0xff]  ;;  %v55_v34 = vld [vmem:[%s678_s0 + $0x28] sm:$0xff]  ;;  %v56_v36 = vld [vmem:[%s678_s0 + $0x30] sm:$0xff] }
   0xa   :  { %463 = vmatprep.subr.bf16.mxu0 %v462_v8  ;;  %488 = vmatprep.subr.bf16.mxu1 %v462_v8  ;;  %v62_v33 = vld [vmem:[%s678_s0 + $0x60] sm:$0xff]  ;;  %v63_v35 = vld [vmem:[%s678_s0 + $0x68] sm:$0xff]  ;;  %v64_v37 = vld [vmem:[%s678_s0 + $0x70] sm:$0xff] }
   0xb   :  { %v57_v38 = vld [vmem:[%s678_s0 + $0x38] sm:$0xff] }
   0xc   :  { %v65_v39 = vld [vmem:[%s678_s0 + $0x78] sm:$0xff] }
   0xd   :  { %465 = vmatpush3.bf16.msra.mxu0 %v462_v8  ;;  %496 = vmatpush3.bf16.msra.mxu1 %v462_v8 }
   0xe   :  { %467 = vmatprep.subr.bf16.mxu0 %v466_v13  ;;  %489 = vmatprep.subr.bf16.mxu1 %v466_v13 }
  0x11   :  { %469 = vmatpush3.bf16.msra.mxu0 %v466_v13  ;;  %497 = vmatpush3.bf16.msra.mxu1 %v466_v13 }
  0x12   :  { %471 = vmatprep.subr.bf16.mxu0 %v470_v16  ;;  %490 = vmatprep.subr.bf16.mxu1 %v470_v16 }
  0x15   :  { %473 = vmatpush3.bf16.msra.mxu0 %v470_v16  ;;  %498 = vmatpush3.bf16.msra.mxu1 %v470_v16 }
  0x16   :  { %475 = vmatprep.subr.bf16.mxu0 %v474_v19  ;;  %491 = vmatprep.subr.bf16.mxu1 %v474_v19 }
  0x19   :  { %477 = vmatpush3.bf16.msra.mxu0 %v474_v19  ;;  %499 = vmatpush3.bf16.msra.mxu1 %v474_v19 }
  0x1a   :  { %479 = vmatprep.subr.bf16.mxu0 %v478_v22  ;;  %492 = vmatprep.subr.bf16.mxu1 %v478_v22 }
  0x1d   :  { %481 = vmatpush3.bf16.msra.mxu0 %v478_v22  ;;  %500 = vmatpush3.bf16.msra.mxu1 %v478_v22 }
  0x1e   :  { %483 = vmatprep.subr.bf16.mxu0 %v482_v25  ;;  %493 = vmatprep.subr.bf16.mxu1 %v482_v25 }
  0x21   :  { %485 = vmatpush3.bf16.msra.mxu0 %v482_v25  ;;  %501 = vmatpush3.bf16.msra.mxu1 %v482_v25 }
  0x24   :  { %431 = vmatmul.mubr.f32.vlgmr.msra.gmra.mrb[0].mxu0 %v51_v26  ;;  %443 = vmatmul.mubr.f32.vlgmr.msra.gmra.mrb[0].mxu1 %v59_v27 }
  0x25   :  { %433 = vmatprep.mubr.f32.mxu0 %v52_v28  ;;  %445 = vmatprep.mubr.f32.mxu1 %v60_v29 }
  0x28   :  { %434 = vmatmul.mubr.f32.gmra.mrb[2].mxu0 %v53_v30  ;;  %446 = vmatmul.mubr.f32.gmra.mrb[2].mxu1 %v61_v31 }
  0x29   :  { %436 = vmatprep.mubr.f32.mxu0 %v54_v32  ;;  %448 = vmatprep.mubr.f32.mxu1 %v62_v33 }
  0x2c   :  { %437 = vmatmul.mubr.f32.gmra.mrb[4].mxu0 %v55_v34  ;;  %449 = vmatmul.mubr.f32.gmra.mrb[4].mxu1 %v63_v35 }
  0x2d   :  { %439 = vmatprep.mubr.f32.mxu0 %v56_v36  ;;  %451 = vmatprep.mubr.f32.mxu1 %v64_v37 }
  0x30   :  { %440 = vmatmul.mubr.f32.gmra.mrb[6].mxu0 %v57_v38  ;;  %452 = vmatmul.mubr.f32.gmra.mrb[6].mxu1 %v65_v39 }
  0xf7   :  { %v432_v40 = vpop.f32.mrb[0].mxu0  ;;  %v444_v41 = vpop.f32.mrb[0].mxu1 }
  0xf8   :  { %279 = vst [vmem:[%s679_s2 + $0x8] sm:$0xff] %v432_v40  ;;  %v316_v42 = vmul.f32 %v432_v40, %v432_v40  ;;  %v148_v43 = vpop.f32.mrb[1].mxu0  ;;  %287 = vst [vmem:[%s679_s2 + $0x48] sm:$0xff] %v444_v41  ;;  %v188_v44 = vpop.f32.mrb[1].mxu1  ;;  %v324_v16 = vmul.f32 %v444_v41, %v444_v41 }
  0xf9   :  { %278 = vst [vmem:[%s679_s2] sm:$0xff] %v148_v43  ;;  %v294_v45 = vadd.f32 %v432_v40, %v148_v43  ;;  %v315_v46 = vmul.f32 %v148_v43, %v148_v43  ;;  %286 = vst [vmem:[%s679_s2 + $0x40] sm:$0xff] %v188_v44  ;;  %v323_v13 = vmul.f32 %v188_v44, %v188_v44 }
  0xfb   :  { %v331_v47 = vadd.f32 %v316_v42, %v315_v46  ;;  %v435_v48 = vpop.f32.mrb[2].mxu0  ;;  %v447_v49 = vpop.f32.mrb[2].mxu1 }
  0xfc   :  { %281 = vst [vmem:[%s679_s2 + $0x18] sm:$0xff] %v435_v48  ;;  %v158_v50 = vpop.f32.mrb[3].mxu0  ;;  %289 = vst [vmem:[%s679_s2 + $0x58] sm:$0xff] %v447_v49  ;;  %v198_v51 = vpop.f32.mrb[3].mxu1  ;;  %v318_v54 = vmul.f32 %v435_v48, %v435_v48  ;;  %v326_v22 = vmul.f32 %v447_v49, %v447_v49 }
  0xfd   :  { %280 = vst [vmem:[%s679_s2 + $0x10] sm:$0xff] %v158_v50  ;;  %v295_v52 = vadd.f32 %v294_v45, %v158_v50  ;;  %v317_v53 = vmul.f32 %v158_v50, %v158_v50  ;;  %288 = vst [vmem:[%s679_s2 + $0x50] sm:$0xff] %v198_v51  ;;  %v325_v19 = vmul.f32 %v198_v51, %v198_v51 }
  0xff   :  { %v332_v55 = vadd.f32 %v331_v47, %v317_v53  ;;  %v438_v56 = vpop.f32.mrb[4].mxu0  ;;  %v296_v57 = vadd.f32 %v435_v48, %v295_v52  ;;  %v450_v58 = vpop.f32.mrb[4].mxu1 }
 0x100   :  { %283 = vst [vmem:[%s679_s2 + $0x28] sm:$0xff] %v438_v56  ;;  %v168_v59 = vpop.f32.mrb[5].mxu0  ;;  %291 = vst [vmem:[%s679_s2 + $0x68] sm:$0xff] %v450_v58  ;;  %v208_v60 = vpop.f32.mrb[5].mxu1  ;;  %v320_v0 = vmul.f32 %v438_v56, %v438_v56  ;;  %v328_v28 = vmul.f32 %v450_v58, %v450_v58 }
 0x101   :  { %282 = vst [vmem:[%s679_s2 + $0x20] sm:$0xff] %v168_v59  ;;  %v297_v61 = vadd.f32 %v296_v57, %v168_v59  ;;  %v319_v62 = vmul.f32 %v168_v59, %v168_v59  ;;  %v333_v63 = vadd.f32 %v332_v55, %v318_v54  ;;  %290 = vst [vmem:[%s679_s2 + $0x60] sm:$0xff] %v208_v60 }
 0x102   :  { %v327_v25 = vmul.f32 %v208_v60, %v208_v60 }
 0x103   :  { %v334_v1 = vadd.f32 %v333_v63, %v319_v62  ;;  %v441_v2 = vpop.f32.mrb[6].mxu0  ;;  %v298_v3 = vadd.f32 %v438_v56, %v297_v61  ;;  %v453_v4 = vpop.f32.mrb[6].mxu1 }
 0x104   :  { %285 = vst [vmem:[%s679_s2 + $0x38] sm:$0xff] %v441_v2  ;;  %v178_v5 = vpop.f32.mrb[7].mxu0  ;;  %293 = vst [vmem:[%s679_s2 + $0x78] sm:$0xff] %v453_v4  ;;  %v218_v6 = vpop.f32.mrb[7].mxu1  ;;  %v322_v10 = vmul.f32 %v441_v2, %v441_v2  ;;  %v330_v34 = vmul.f32 %v453_v4, %v453_v4 }
 0x105   :  { %284 = vst [vmem:[%s679_s2 + $0x30] sm:$0xff] %v178_v5  ;;  %v299_v7 = vadd.f32 %v298_v3, %v178_v5  ;;  %v321_v8 = vmul.f32 %v178_v5, %v178_v5  ;;  %v335_v9 = vadd.f32 %v334_v1, %v320_v0  ;;  %292 = vst [vmem:[%s679_s2 + $0x70] sm:$0xff] %v218_v6 }
 0x106   :  { %v329_v31 = vmul.f32 %v218_v6, %v218_v6 }
 0x107   :  { %v300_v11 = vadd.f32 %v441_v2, %v299_v7  ;;  %v336_v12 = vadd.f32 %v335_v9, %v321_v8 }
 0x109   :  { %v337_v14 = vadd.f32 %v336_v12, %v322_v10  ;;  %v301_v15 = vadd.f32 %v300_v11, %v188_v44 }
 0x10b   :  { %v338_v17 = vadd.f32 %v337_v14, %v323_v13  ;;  %v302_v18 = vadd.f32 %v444_v41, %v301_v15 }
 0x10d   :  { %v303_v20 = vadd.f32 %v302_v18, %v198_v51  ;;  %v339_v21 = vadd.f32 %v338_v17, %v324_v16 }
 0x10f   :  { %v340_v23 = vadd.f32 %v339_v21, %v325_v19  ;;  %v304_v24 = vadd.f32 %v447_v49, %v303_v20 }
 0x111   :  { %v305_v26 = vadd.f32 %v304_v24, %v208_v60  ;;  %v341_v27 = vadd.f32 %v340_v23, %v326_v22 }
 0x113   :  { %v342_v29 = vadd.f32 %v341_v27, %v327_v25  ;;  %v306_v30 = vadd.f32 %v450_v58, %v305_v26 }
 0x115   :  { %v307_v32 = vadd.f32 %v306_v30, %v218_v6  ;;  %v343_v33 = vadd.f32 %v342_v29, %v328_v28 }
 0x117   :  { %v308_v35 = vadd.f32 %v453_v4, %v307_v32  ;;  %v344_v36 = vadd.f32 %v343_v33, %v329_v31 }
 0x119   :  { %v309_v37 = vrot.slane %v308_v35, 4  ;;  %v345_v38 = vadd.f32 %v344_v36, %v330_v34 }
 0x11b   :  { %v310_v39 = vadd.f32 %v309_v37, %v308_v35  ;;  %v346_v40 = vrot.slane %v345_v38, 4 }
 0x11d   :  { %v311_v41 = vrot.slane %v310_v39, 2  ;;  %v347_v42 = vadd.f32 %v346_v40, %v345_v38 }
 0x11f   :  { %v312_v43 = vadd.f32 %v311_v41, %v310_v39  ;;  %v348_v44 = vrot.slane %v347_v42, 2 }
 0x121   :  { %v313_v45 = vrot.slane %v312_v43, 1  ;;  %v349_v46 = vadd.f32 %v348_v44, %v347_v42 }
 0x123   :  { %v314_v47 = vadd.f32 %v313_v45, %v312_v43  ;;  %v350_v48 = vrot.slane %v349_v46, 1 }
 0x125   :  { %v351_v49 = vadd.f32 %v350_v48, %v349_v46  ;;  %352 = vst [vmem:[%s680_s3] sm:$0xff] %v314_v47 }
 0x127   :  { %353 = vst [vmem:[%s681_s4] sm:$0xff] %v351_v49 }

</bundles_post_ra>
